<compile_context>
chip_gen: v7x
topology: tpu7x:2x2x1
jax: 0.10.0
libtpu: 0.0.40
codegen_flags: <defaults>
</compile_context>

<pallas_src>
import functools
import math

import jax
import jax.numpy as jnp
from jax import lax
from jax.experimental import pallas as pl
from jax.experimental.pallas import tpu as pltpu


def _sdpa_kernel(inv_sqrt_dk, q_ref, k_ref, v_ref, mask_ref, ctx_ref, attn_ref):
    # Block shapes (leading size-1 batch dim dropped by the [0] index):
    #   q:    [HB, TQ, Dk]      k: [HB, Lk, Dk]      v: [HB, Lk, Dv]
    #   mask: [HB, TQ, Lk] i8   ctx: [HB, TQ, Dv]    attn: [HB, TQ, Lk]
    q = q_ref[0]
    k = k_ref[0]
    v = v_ref[0]
    m = mask_ref[0].astype(jnp.int32)  # int8 in HBM; widen only for the compare

    # Fold 1/sqrt(d_k) into Q before the matmul: O(TQ*Dk) instead of an
    # O(TQ*Lk) VPU pass over the scores.
    q_scaled = q * jnp.asarray(inv_sqrt_dk, dtype=q.dtype)

    # scores = Q @ K^T: contract the trailing Dk dims directly (batched over
    # the folded head dim) so no explicit K transpose is materialized.
    scores = lax.dot_general(
        q_scaled, k,
        dimension_numbers=(((2,), (2,)), ((0,), (0,))),
        preferred_element_type=jnp.float32)               # [HB, TQ, Lk] f32

    # masked_fill_(attn_mask, -1e9)
    scores = jnp.where(m != 0, jnp.float32(-1000000000.0), scores)

    # Numerically stable softmax along the key axis (f32).
    s_max = jnp.max(scores, axis=-1, keepdims=True)
    e = jnp.exp(scores - s_max)
    denom = jnp.sum(e, axis=-1, keepdims=True)
    # Exact reciprocal keeps attn within ~1e-6 of the reference (tight test
    # tolerance); flip to approx=True (free EUP vrcp) if ~1e-3 rel is OK.
    attn = e * pl.reciprocal(denom, approx=False)

    # context = attn @ V (MXU, operands in V's native dtype, f32 accumulate).
    ctx = lax.dot_general(
        attn.astype(v.dtype), v,
        dimension_numbers=(((2,), (1,)), ((0,), (0,))),
        preferred_element_type=jnp.float32)                # [HB, TQ, Dv]

    attn_ref[0] = attn.astype(attn_ref.dtype)
    ctx_ref[0] = ctx.astype(ctx_ref.dtype)


_VMEM_BUDGET = 24 * 1024 * 1024  # per-step working-set target (bytes)


def _pick_tiles(H, Lq, Lk, Dk, Dv, in_itemsize, out_itemsize):
    """Choose (head_block, query_tile) so the per-step VMEM footprint fits."""

    def footprint(hb, tq):
        blocks = hb * (
            tq * Dk * in_itemsize        # Q tile
            + Lk * Dk * in_itemsize      # K (full Lk)
            + Lk * Dv * in_itemsize      # V (full Lk)
            + tq * Lk * 1                # int8 mask tile
            + tq * Dv * out_itemsize     # context tile
            + tq * Lk * out_itemsize     # attn tile
        )
        live = hb * tq * (2 * Lk + Dv) * 4   # f32 scores/exp/ctx temporaries
        return 2 * blocks + live             # x2: double-buffered pipeline

    # Query tile: prefer large, (8,128)-friendly tiles that divide Lq; fall
    # back to the full Lq extent (always a legal full-dim block).
    divisors = [c for c in (512, 256, 128, 64, 32) if c <= Lq and Lq % c == 0]
    tq = Lq
    for cand in divisors:
        if footprint(1, cand) <= _VMEM_BUDGET:
            tq = cand
            break
    else:
        if divisors:
            tq = divisors[-1]

    # Head block: fold as many heads per grid step as the budget allows
    # (amortizes per-step overhead, fills 128-lane vregs for tiny Dk/Lk heads).
    hb = 1
    for cand in range(H, 0, -1):
        if H % cand == 0 and footprint(cand, tq) <= _VMEM_BUDGET:
            hb = cand
            break
    return hb, tq, footprint(hb, tq)


def scaled_dot_product_attention(Q, K, V, attn_mask):
    """Q: [B,H,Lq,Dk], K: [B,H,Lk,Dk], V: [B,H,Lk,Dv], attn_mask: [B,H,Lq,Lk] bool."""
    B, H, Lq, Dk = Q.shape
    Lk = K.shape[2]
    Dv = V.shape[3]
    out_dtype = Q.dtype

    mask_i8 = attn_mask.astype(jnp.int8)  # 4x less mask HBM traffic than int32

    in_itemsize = jnp.dtype(Q.dtype).itemsize
    out_itemsize = jnp.dtype(out_dtype).itemsize
    HB, TQ, footprint = _pick_tiles(H, Lq, Lk, Dk, Dv, in_itemsize, out_itemsize)

    grid = (B, H // HB, Lq // TQ)

    # Explicit VMEM budget derived from the chosen blocks (with headroom),
    # capped below v7x's 64 MiB physical VMEM.
    vmem_limit = min(64 * 1024 * 1024,
                     max(int(1.5 * footprint), 32 * 1024 * 1024))

    kernel = functools.partial(_sdpa_kernel, 1.0 / math.sqrt(Dk))

    ctx, attn = pl.pallas_call(
        kernel,
        out_shape=(
            jax.ShapeDtypeStruct((B, H, Lq, Dv), out_dtype),
            jax.ShapeDtypeStruct((B, H, Lq, Lk), out_dtype),
        ),
        grid_spec=pltpu.PrefetchScalarGridSpec(
            num_scalar_prefetch=0,
            grid=grid,
            in_specs=[
                pl.BlockSpec((1, HB, TQ, Dk), lambda b, h, q: (b, h, q, 0)),
                pl.BlockSpec((1, HB, Lk, Dk), lambda b, h, q: (b, h, 0, 0)),
                pl.BlockSpec((1, HB, Lk, Dv), lambda b, h, q: (b, h, 0, 0)),
                pl.BlockSpec((1, HB, TQ, Lk), lambda b, h, q: (b, h, q, 0)),
            ],
            out_specs=[
                pl.BlockSpec((1, HB, TQ, Dv), lambda b, h, q: (b, h, q, 0)),
                pl.BlockSpec((1, HB, TQ, Lk), lambda b, h, q: (b, h, q, 0)),
            ],
        ),
        compiler_params=pltpu.CompilerParams(
            dimension_semantics=("parallel", "parallel", "parallel"),
            vmem_limit_bytes=vmem_limit,
        ),
    )(Q, K, V, mask_i8)
    return ctx, attn


def _reference(Q, K, V, attn_mask):
    d_k = Q.shape[-1]
    scores = jnp.einsum("bhqd,bhkd->bhqk", Q, K) / math.sqrt(d_k)
    scores = jnp.where(attn_mask, -1000000000.0, scores)
    attn = jax.nn.softmax(scores, axis=-1)
    ctx = jnp.einsum("bhqk,bhkd->bhqd", attn, V)
    return ctx, attn


if __name__ == "__main__":
    B, H, Lq, Lk, Dk, Dv = 2, 4, 8, 8, 32, 32

    key = jax.random.PRNGKey(0)
    kq, kk, kv, km = jax.random.split(key, 4)
    Q = jax.random.normal(kq, (B, H, Lq, Dk), dtype=jnp.float32)
    K = jax.random.normal(kk, (B, H, Lk, Dk), dtype=jnp.float32)
    V = jax.random.normal(kv, (B, H, Lk, Dv), dtype=jnp.float32)
    # Boolean mask: True entries are masked out (filled with -1e9).
    attn_mask = jax.random.bernoulli(km, p=0.25, shape=(B, H, Lq, Lk))

    ctx, attn = scaled_dot_product_attention(Q, K, V, attn_mask)
    jax.block_until_ready((ctx, attn))

    ctx_ref, attn_ref = _reference(Q, K, V, attn_mask)
    assert jnp.allclose(ctx, ctx_ref, atol=1e-4, rtol=1e-4)
    assert jnp.allclose(attn, attn_ref, atol=1e-5, rtol=1e-4)

    print("KERNEL_OK")
</pallas_src>

<mosaic_0001>
module attributes {stable_mosaic.version = 11 : i64} {
  func.func @_sdpa_kernel(%arg0: i32, %arg1: i32, %arg2: i32, %arg3: memref<1x4x8x32xf32, #tpu.memory_space<vmem>>, %arg4: memref<1x4x8x32xf32, #tpu.memory_space<vmem>>, %arg5: memref<1x4x8x32xf32, #tpu.memory_space<vmem>>, %arg6: memref<1x4x8x8xi8, #tpu.memory_space<vmem>>, %arg7: memref<1x4x8x32xf32, #tpu.memory_space<vmem>>, %arg8: memref<1x4x8x8xf32, #tpu.memory_space<vmem>>) attributes {dimension_semantics = [#tpu.dimension_semantics<parallel>, #tpu.dimension_semantics<parallel>, #tpu.dimension_semantics<parallel>], iteration_bounds = array<i64: 2, 1, 1>, scalar_prefetch = 0 : i64, scratch_operands = 0 : i64, tpu.core_type = #tpu.core_type<tc>, window_params = [{transform_indices = @transform_0, window_bounds = array<i64: 1, 4, 8, 32>}, {transform_indices = @transform_1, window_bounds = array<i64: 1, 4, 8, 32>}, {transform_indices = @transform_2, window_bounds = array<i64: 1, 4, 8, 32>}, {transform_indices = @transform_3, window_bounds = array<i64: 1, 4, 8, 8>}, {transform_indices = @transform_4, window_bounds = array<i64: 1, 4, 8, 32>}, {transform_indices = @transform_5, window_bounds = array<i64: 1, 4, 8, 8>}]} {
    %c0 = arith.constant 0 : index
    %c0_0 = arith.constant 0 : index
    %c0_1 = arith.constant 0 : index
    %c0_2 = arith.constant 0 : index
    %0 = vector.load %arg3[%c0, %c0_0, %c0_1, %c0_2] : memref<1x4x8x32xf32, #tpu.memory_space<vmem>>, vector<1x4x8x32xf32>
    %1 = vector.shape_cast %0 : vector<1x4x8x32xf32> to vector<4x8x32xf32>
    %c0_3 = arith.constant 0 : index
    %c0_4 = arith.constant 0 : index
    %c0_5 = arith.constant 0 : index
    %c0_6 = arith.constant 0 : index
    %2 = vector.load %arg4[%c0_3, %c0_4, %c0_5, %c0_6] : memref<1x4x8x32xf32, #tpu.memory_space<vmem>>, vector<1x4x8x32xf32>
    %3 = vector.shape_cast %2 : vector<1x4x8x32xf32> to vector<4x8x32xf32>
    %c0_7 = arith.constant 0 : index
    %c0_8 = arith.constant 0 : index
    %c0_9 = arith.constant 0 : index
    %c0_10 = arith.constant 0 : index
    %4 = vector.load %arg5[%c0_7, %c0_8, %c0_9, %c0_10] : memref<1x4x8x32xf32, #tpu.memory_space<vmem>>, vector<1x4x8x32xf32>
    %5 = vector.shape_cast %4 : vector<1x4x8x32xf32> to vector<4x8x32xf32>
    %c0_11 = arith.constant 0 : index
    %c0_12 = arith.constant 0 : index
    %c0_13 = arith.constant 0 : index
    %c0_14 = arith.constant 0 : index
    %6 = vector.load %arg6[%c0_11, %c0_12, %c0_13, %c0_14] : memref<1x4x8x8xi8, #tpu.memory_space<vmem>>, vector<1x4x8x8xi8>
    %7 = vector.shape_cast %6 : vector<1x4x8x8xi8> to vector<4x8x8xi8>
    %8 = arith.extsi %7 : vector<4x8x8xi8> to vector<4x8x8xi32>
    %cst = arith.constant 0.176776692 : f32
    %9 = vector.broadcast %cst : f32 to vector<4x8x32xf32>
    %10 = arith.mulf %1, %9 : vector<4x8x32xf32>
    %cst_15 = arith.constant dense<0.000000e+00> : vector<4x8x8xf32>
    %11 = tpu.matmul %10, %3, %cst_15 {dimension_numbers = #tpu.dot_dimension_numbers<[2], [2], [1], [1], [0, 0, 0, 1, 1, 1], [0], [0]>} : vector<4x8x32xf32>, vector<4x8x32xf32>, vector<4x8x8xf32> -> vector<4x8x8xf32>
    %c0_i32 = arith.constant 0 : i32
    %12 = vector.broadcast %c0_i32 : i32 to vector<4x8x8xi32>
    %13 = arith.cmpi ne, %8, %12 : vector<4x8x8xi32>
    %cst_16 = arith.constant -1.000000e+09 : f32
    %14 = vector.broadcast %cst_16 : f32 to vector<4x8x8xf32>
    %15 = arith.select %13, %14, %11 : vector<4x8x8xi1>, vector<4x8x8xf32>
    %cst_17 = arith.constant dense<0xFF800000> : vector<4x8xf32>
    %16 = vector.multi_reduction <maximumf>, %15, %cst_17 [2] : vector<4x8x8xf32> to vector<4x8xf32>
    %17 = vector.shape_cast %16 : vector<4x8xf32> to vector<4x8x1xf32>
    %18 = vector.broadcast %17 : vector<4x8x1xf32> to vector<4x8x8xf32>
    %19 = arith.subf %15, %18 : vector<4x8x8xf32>
    %20 = math.exp %19 : vector<4x8x8xf32>
    %cst_18 = arith.constant dense<0.000000e+00> : vector<4x8xf32>
    %21 = vector.multi_reduction <add>, %20, %cst_18 [2] : vector<4x8x8xf32> to vector<4x8xf32>
    %22 = vector.shape_cast %21 : vector<4x8xf32> to vector<4x8x1xf32>
    %23 = tpu.reciprocal %22 : vector<4x8x1xf32> -> vector<4x8x1xf32>
    %24 = vector.broadcast %23 : vector<4x8x1xf32> to vector<4x8x8xf32>
    %25 = arith.mulf %20, %24 : vector<4x8x8xf32>
    %cst_19 = arith.constant dense<0.000000e+00> : vector<4x8x32xf32>
    %26 = tpu.matmul %25, %5, %cst_19 {dimension_numbers = #tpu.dot_dimension_numbers<[2], [1], [1], [2], [0, 0, 0, 1, 1, 2], [0], [0]>} : vector<4x8x8xf32>, vector<4x8x32xf32>, vector<4x8x32xf32> -> vector<4x8x32xf32>
    %c0_20 = arith.constant 0 : index
    %c0_21 = arith.constant 0 : index
    %c0_22 = arith.constant 0 : index
    %c0_23 = arith.constant 0 : index
    %27 = vector.load %arg8[%c0_20, %c0_21, %c0_22, %c0_23] : memref<1x4x8x8xf32, #tpu.memory_space<vmem>>, vector<1x4x8x8xf32>
    %28 = vector.shape_cast %27 : vector<1x4x8x8xf32> to vector<4x8x8xf32>
    %29 = vector.shape_cast %25 : vector<4x8x8xf32> to vector<1x4x8x8xf32>
    tpu.vector_store %arg8[%c0_20, %c0_21, %c0_22, %c0_23], %29 {strides = array<i32>} : memref<1x4x8x8xf32, #tpu.memory_space<vmem>>, vector<1x4x8x8xf32>,
    %c0_24 = arith.constant 0 : index
    %c0_25 = arith.constant 0 : index
    %c0_26 = arith.constant 0 : index
    %c0_27 = arith.constant 0 : index
    %30 = vector.load %arg7[%c0_24, %c0_25, %c0_26, %c0_27] : memref<1x4x8x32xf32, #tpu.memory_space<vmem>>, vector<1x4x8x32xf32>
    %31 = vector.shape_cast %30 : vector<1x4x8x32xf32> to vector<4x8x32xf32>
    %32 = vector.shape_cast %26 : vector<4x8x32xf32> to vector<1x4x8x32xf32>
    tpu.vector_store %arg7[%c0_24, %c0_25, %c0_26, %c0_27], %32 {strides = array<i32>} : memref<1x4x8x32xf32, #tpu.memory_space<vmem>>, vector<1x4x8x32xf32>,
    return
  }
  func.func @transform_0(%arg0: i32, %arg1: i32, %arg2: i32) -> (i32, i32, i32, i32) {
    %c0_i32 = arith.constant 0 : i32
    %c0_i32_0 = arith.constant 0 : i32
    return %arg0, %arg1, %arg2, %c0_i32 : i32, i32, i32, i32
  }
  func.func @transform_1(%arg0: i32, %arg1: i32, %arg2: i32) -> (i32, i32, i32, i32) {
    %c0_i32 = arith.constant 0 : i32
    %c0_i32_0 = arith.constant 0 : i32
    %c0_i32_1 = arith.constant 0 : i32
    return %arg0, %arg1, %c0_i32, %c0_i32_0 : i32, i32, i32, i32
  }
  func.func @transform_2(%arg0: i32, %arg1: i32, %arg2: i32) -> (i32, i32, i32, i32) {
    %c0_i32 = arith.constant 0 : i32
    %c0_i32_0 = arith.constant 0 : i32
    %c0_i32_1 = arith.constant 0 : i32
    return %arg0, %arg1, %c0_i32, %c0_i32_0 : i32, i32, i32, i32
  }
  func.func @transform_3(%arg0: i32, %arg1: i32, %arg2: i32) -> (i32, i32, i32, i32) {
    %c0_i32 = arith.constant 0 : i32
    %c0_i32_0 = arith.constant 0 : i32
    return %arg0, %arg1, %arg2, %c0_i32 : i32, i32, i32, i32
  }
  func.func @transform_4(%arg0: i32, %arg1: i32, %arg2: i32) -> (i32, i32, i32, i32) {
    %c0_i32 = arith.constant 0 : i32
    %c0_i32_0 = arith.constant 0 : i32
    return %arg0, %arg1, %arg2, %c0_i32 : i32, i32, i32, i32
  }
  func.func @transform_5(%arg0: i32, %arg1: i32, %arg2: i32) -> (i32, i32, i32, i32) {
    %c0_i32 = arith.constant 0 : i32
    %c0_i32_0 = arith.constant 0 : i32
    return %arg0, %arg1, %arg2, %c0_i32 : i32, i32, i32, i32
  }
}

</mosaic_0001>

<bundles_post_ra>
// kernel: tpu_custom_call.1
= control target key start
LH: loop header
LB: loop body
LE: loop exit
PB: predicated region body
PF: predicated region fallthrough
CT: control target
= control target key end

     0   :  { %s2294_s0 = inlined_call_operand.hbm [shape: f32[2,4,8,32], index: 0, kind: input, shape index: {}]   ;;  %s2295_s1 = inlined_call_operand.hbm [shape: f32[2,4,8,32], index: 1, kind: input, shape index: {}]   ;;  %s2296_s2 = inlined_call_operand.hbm [shape: f32[2,4,8,32], index: 2, kind: input, shape index: {}]   ;;  %s2297_s3 = inlined_call_operand.hbm [shape: s8[2,4,8,8], index: 3, kind: input, shape index: {}]   ;;  %s2298_s4 = inlined_call_operand.hbm [shape: f32[2,4,8,32], index: 4, kind: output, shape index: {0}]   ;;  %s2299_s5 = inlined_call_operand.hbm [shape: f32[2,4,8,8], index: 5, kind: output, shape index: {1}]  }
   0x1   :  { %2312 = sst [smem:[#allocation24_spill]] %s2294_s0 }
   0x2   :  { %2313 = sst [smem:[#allocation25_spill]] %s2295_s1 }
   0x3   :  { %11 = vsyncpa [#allocation3], 0 }
   0x4   :  { %13 = vsyncpa [#allocation3 + $0x1], 0 }
   0x5   :  { %14 = vsyncpa [#allocation6], 0 }
   0x6   :  { %16 = vsyncpa [#allocation6 + $0x1], 0 }
   0x7   :  { %17 = vsyncpa [#allocation9], 0 }
   0x8   :  { %19 = vsyncpa [#allocation9 + $0x1], 0 }
   0x9   :  { %20 = vsyncpa [#allocation4], 0 }
   0xa   :  { %22 = vsyncpa [#allocation4 + $0x1], 0 }
   0xb   :  { %23 = vsyncpa [#allocation12], 0 }
   0xc   :  { %25 = vsyncpa [#allocation12 + $0x1], 0  ;;  %s1861_s18 = smov 0   ;;  %s1863_s19 = smov 0  }
   0xd   :  { %s1865_s20 = smov 0   ;;  %s1867_s21 = smov 0  }
   0xe   :  { %s1869_s22 = smov 0   ;;  %s1871_s23 = smov 0  }
   0xf LB: > { %2314 = sst [smem:[#allocation18_spill]] %s1795_s18  ;;  %s1892_s24 = sadd.s32 4294967295, %s1815_s23   ;;  %s1815_s23 = sphi %s1871_s23, %s31_s23   ;;  %s1811_s22 = sphi %s1869_s22, %s2347_s22   ;;  %s1807_s21 = sphi %s1867_s21, %s2346_s21   ;;  %s1803_s20 = sphi %s1865_s20, %s2342_s20   ;;  %s1799_s19 = sphi %s1863_s19, %s2345_s19   ;;  %s1795_s18 = sphi %s1861_s18, %s2344_s18  }
  0x10   : > { %2315 = sst [smem:[#allocation19_spill]] %s1803_s20  ;;  %s1354_s25 = sadd.s32 4294967294, %s1815_s23  }
  0x11   : > { %2316 = sst [smem:[#allocation20_spill]] %s1815_s23  ;;  %s50_s26 = sadd.s32 1, %s1811_s22 }
  0x12   : > { %s61_s27 = sadd.s32 1, %s1803_s20  ;;  %p52_p0 = scmp.ge.s32.totalorder %s50_s26, 2 }
  0x13   : > { %p68_p1 = scmp.ne.s32.totalorder %s1803_s20, %s1799_s19  ;;  %p69_p2 = scmp.eq.s32.totalorder %s1815_s23, 0 }
  0x14   : > { %p74_p3 = scmp.ne.s32.totalorder %s1799_s19, %s1795_s18  ;;  %s2349_s26 = smov (%p52_p0, %s50_s26), 0 }
  0x15   : > { %2317 = sst [smem:[#allocation21_spill]] %s2349_s26  ;;  %p1904_p4 = por %p69_p2, %p68_p1 }
  0x16   : > { %p75_p5 = scmp.eq.s32.totalorder %s1892_s24, 0  ;;  %s54_s29 = ssub.s32 %s1811_s22, %s2349_s26 }
  0x17   : > { %p188_p6 = scmp.eq.s32.totalorder %s1892_s24, 1  ;;  %p59_p7 = scmp.eq.s32.totalorder %s54_s29, 0 }
  0x18   : > { %p1912_p8 = por %p75_p5, %p74_p3  ;;  %p194_p10 = scmp.eq.s32.totalorder %s1354_s25, 1 }
  0x19   : > { %p1916_p9 = por %p188_p6, %p68_p1  ;;  %p1499_p13 = scmp.lt.s32.totalorder %s1815_s23, 2 }
  0x1a   : > { %s2319_s30 = scalar_select %p1912_p8, 1, 0 }
  0x1b   : > { %s2320_s6 = scalar_select %p1916_p9, 1, 0 }
  0x1c   : > { %s1921_s7 = scalar_select %p59_p7, %s1803_s20, %s61_s27  }
  0x1d   : > { %p1923_p11 = por %p194_p10, %p74_p3  ;;  %s1930_s9 = sand.u32 1, %s1803_s20  }
  0x1e   : > { %2321 = sst [smem:[#allocation22_spill]] %s1921_s7  ;;  %s1933_s10 = sshll.u32 %s1930_s9, 5 }
  0x1f   : > { %s2322_s8 = scalar_select %p1923_p11, 1, 0 }
  0x20   : > { %s1936_s11 = sshll.u32 %s1811_s22, 9  ;;  %p1940_p0 = pnand %p1499_p13, %p1904_p4 }
  0x21   : > { %2323 = sst [smem:[#allocation23_spill]] %s2322_s8  ;;  %s268_s13 = sand.u32 1, %s1815_s23  }
  0x22   : > { %s2325_s1 = sld [smem:[#allocation25_spill]]  ;;  %s272_s17 = scalar_lea.vmem [#allocation5], %s1933_s10 }
  0x23   : > { %s281_s25 = sshll.u32 %s272_s17, 4  ;;  %s1956_s27 = scalar_lea.sflag [#allocation6], %s268_s13  ;;  %s1953_s25 = int_to_ptr.vmem [resolvable:$true] %s281_s25 }
  0x24   : > { %p1962_p4 = pneg %p1940_p0 }
  0x28   : > { %s1949_s16 = scalar_lea.hbm %s2325_s1, %s1936_s11  ;;  %s1578_s17 = scalar_lea.hbm %s2325_s1, 1024 }
  0x29   : > { %s1573_s28 = scalar_lea.hbm %s1949_s16, 512  ;;  %p1579_p7 = scmp.lt.u32.totalorder %s1949_s16, %s2325_s1 }
  0x2a   : > { %p1574_p3 = scmp.ne.s32.totalorder %s1949_s16, %s1573_s28  ;;  %p1580_p10 = scmp.lt.u32.totalorder %s1578_s17, %s1573_s28 }
  0x2b   : > { %p1582_p12 = scmp.lt.u32.totalorder %s1573_s28, %s1949_s16 }
  0x2c   : > { %p1576_p5 = pnand %p1962_p4, %p1574_p3  ;;  %p1581_p13 = por %p1580_p10, %p1579_p7 }
  0x2e   : > { %p1577_p6 = pneg %p1576_p5  ;;  %p1583_p1 = por %p1582_p12, %p1581_p13 }
  0x30   : > { %p1584_p2 = pnand %p1583_p1, %p1577_p6 }
  0x32   : > { %1587 = shalt.err (!%p1584_p2)
}
  0x33   : > { %s1588_s13 = scalar_lea.vmem %s1953_s25, 512  ;;  %s1817_s14 = smov [#allocation5]  }
  0x34   : > { %p1589_p3 = scmp.ne.s32.totalorder %s1953_s25, %s1588_s13  ;;  %s1593_s15 = sshll.u32 %s1817_s14, 4  ;;  %s1594_s15 = int_to_ptr.vmem [resolvable:$false] %s1593_s15 }
  0x35   : > { %s1595_s26 = scalar_lea.vmem %s1594_s15, 1024  ;;  %p1596_p9 = scmp.lt.s32.totalorder %s1953_s25, %s1594_s15 }
  0x36   : > { %p1591_p5 = pnand %p1589_p3, %p1962_p4  ;;  %p1597_p8 = scmp.lt.s32.totalorder %s1595_s26, %s1588_s13 }
  0x38   : > { %p1592_p11 = pneg %p1591_p5  ;;  %p1598_p7 = por %p1597_p8, %p1596_p9 }
  0x3a   : > { %p1599_p10 = pnand %p1598_p7, %p1592_p11 }
  0x3c   : > { %1602 = shalt.err (!%p1599_p10)
}
  0x3d   : > { %s2303_s7 = smov 128   ;;  %s2305_s28 = smov 8  }
  0x3e   : > { %1485 = dma.hbm_to_vmem [thread:$0]  (!%p1940_p0), %s1949_s16, 512, %s1953_s25, %s1956_s27, %s2303_s7, %s2303_s7, %s2305_s28  }
  0x3f   : > { %p2327_p8 = scmp.lt.s32.totalorder %s1815_s23, 3  ;;  %p2328_p9 = scmp.ge.s32.totalorder %s1815_s23, 1 }
  0x40   : > { %s2330_s0 = sld [smem:[#allocation24_spill]]  ;;  %s248_s26 = scalar_lea.vmem [#allocation2], %s1933_s10 }
  0x41   : > { %p1993_p11 = pnand %p2328_p9, %p2327_p8  ;;  %s258_s1 = sshll.u32 %s248_s26, 4  ;;  %s2004_s1 = int_to_ptr.vmem [resolvable:$true] %s258_s1 }
  0x42   : > { %s2010_s7 = scalar_lea.hbm %s2296_s2, %s1936_s11  ;;  %s245_s28 = scalar_lea.sflag [#allocation3], %s1930_s9 }
  0x43   : > { %s2329_s17 = scalar_select %p1993_p11, 1, 0 }
  0x46   : > { %s2001_s15 = scalar_lea.hbm %s2330_s0, %s1936_s11  ;;  %s1608_s23 = scalar_lea.hbm %s2330_s0, 1024 }
  0x47   : > { %s1603_s20 = scalar_lea.hbm %s2001_s15, 512  ;;  %p1609_p6 = scmp.lt.u32.totalorder %s2001_s15, %s2330_s0 }
  0x48   : > { %p1604_p12 = scmp.ne.s32.totalorder %s2001_s15, %s1603_s20  ;;  %p1610_p13 = scmp.lt.u32.totalorder %s1608_s23, %s1603_s20 }
  0x49   : > { %p1612_p5 = scmp.lt.u32.totalorder %s1603_s20, %s2001_s15 }
  0x4a   : > { %p1606_p1 = pnand %p1604_p12, %p1962_p4  ;;  %p1611_p3 = por %p1610_p13, %p1609_p6 }
  0x4c   : > { %p1607_p2 = pneg %p1606_p1  ;;  %p1613_p7 = por %p1612_p5, %p1611_p3 }
  0x4e   : > { %p1614_p10 = pnand %p1613_p7, %p1607_p2 }
  0x50   : > { %1617 = shalt.err (!%p1614_p10)
}
  0x51   : > { %s1618_s11 = scalar_lea.vmem %s2004_s1, 512  ;;  %s1820_s26 = smov [#allocation2]  }
  0x52   : > { %p1619_p8 = scmp.ne.s32.totalorder %s2004_s1, %s1618_s11  ;;  %s1623_s16 = sshll.u32 %s1820_s26, 4  ;;  %s1624_s16 = int_to_ptr.vmem [resolvable:$false] %s1623_s16 }
  0x53   : > { %s1625_s18 = scalar_lea.vmem %s1624_s16, 1024  ;;  %p1626_p1 = scmp.lt.s32.totalorder %s2004_s1, %s1624_s16 }
  0x54   : > { %p1621_p9 = pnand %p1619_p8, %p1962_p4  ;;  %p1627_p11 = scmp.lt.s32.totalorder %s1625_s18, %s1618_s11 }
  0x56   : > { %p1622_p12 = pneg %p1621_p9  ;;  %p1628_p6 = por %p1627_p11, %p1626_p1 }
  0x58   : > { %p1629_p13 = pnand %p1628_p6, %p1622_p12 }
  0x5a   : > { %1632 = shalt.err (!%p1629_p13)
}
  0x5b   : > { %s2331_s20 = smov 8   ;;  %s2332_s23 = smov 128  }
  0x5c   : > { %1482 = dma.hbm_to_vmem [thread:$0]  (!%p1940_p0), %s2001_s15, 512, %s2004_s1, %s245_s28, %s2332_s23, %s2332_s23, %s2331_s20  }
  0x5d   : > { %s295_s8 = scalar_lea.vmem [#allocation7], %s1933_s10  ;;  %s1366_s13 = sshll.u32 %s1930_s9, 3 }
  0x5e   : > { %s304_s25 = sshll.u32 %s295_s8, 4  ;;  %s1633_s14 = scalar_lea.hbm %s2010_s7, 512  ;;  %s2040_s25 = int_to_ptr.vmem [resolvable:$true] %s304_s25 }
  0x5f   : > { %p1634_p11 = scmp.ne.s32.totalorder %s2010_s7, %s1633_s14  ;;  %s1638_s16 = scalar_lea.hbm %s2296_s2, 1024 }
  0x60   : > { %p1639_p5 = scmp.lt.u32.totalorder %s2010_s7, %s2296_s2  ;;  %p1640_p7 = scmp.lt.u32.totalorder %s1638_s16, %s1633_s14 }
  0x61   : > { %p1636_p2 = pnand %p1634_p11, %p1962_p4  ;;  %p1642_p8 = scmp.lt.u32.totalorder %s1633_s14, %s2010_s7 }
  0x62   : > { %p1641_p10 = por %p1640_p7, %p1639_p5 }
  0x63   : > { %p1637_p3 = pneg %p1636_p2 }
  0x64   : > { %p1643_p9 = por %p1642_p8, %p1641_p10 }
  0x66   : > { %p1644_p12 = pnand %p1643_p9, %p1637_p3 }
  0x68   : > { %1647 = shalt.err (!%p1644_p12)
}
  0x69   : > { %s1648_s1 = scalar_lea.vmem %s2040_s25, 512  ;;  %s1821_s10 = smov [#allocation7]  }
  0x6a   : > { %p1649_p1 = scmp.ne.s32.totalorder %s2040_s25, %s1648_s1  ;;  %s1653_s28 = sshll.u32 %s1821_s10, 4  ;;  %s1654_s28 = int_to_ptr.vmem [resolvable:$false] %s1653_s28 }
  0x6b   : > { %s1655_s0 = scalar_lea.vmem %s1654_s28, 1024  ;;  %p1656_p11 = scmp.lt.s32.totalorder %s2040_s25, %s1654_s28 }
  0x6c   : > { %p1651_p6 = pnand %p1649_p1, %p1962_p4  ;;  %p1657_p2 = scmp.lt.s32.totalorder %s1655_s0, %s1648_s1 }
  0x6e   : > { %p1652_p13 = pneg %p1651_p6  ;;  %p1658_p5 = por %p1657_p2, %p1656_p11 }
  0x70   : > { %p1659_p7 = pnand %p1658_p5, %p1652_p13 }
  0x72   : > { %1662 = shalt.err (!%p1659_p7)
}
  0x73   : > { %1488 = dma.hbm_to_vmem [thread:$0]  (!%p1940_p0), %s2010_s7, 512, %s2040_s25, %s1956_s27, %s2332_s23, %s2332_s23, %s2331_s20  }
  0x74   : > { %s1399_s15 = sshll.u32 %s1811_s22, 7  ;;  %s318_s26 = scalar_lea.vmem [#allocation8], %s1366_s13 }
  0x75   : > { %s2072_s11 = scalar_lea.hbm %s2297_s3, %s1399_s15  ;;  %s328_s16 = sshll.u32 %s318_s26, 4  ;;  %s2076_s16 = int_to_ptr.vmem [resolvable:$true] %s328_s16 }
  0x76   : > { %s315_s18 = scalar_lea.sflag [#allocation9], %s1930_s9  ;;  %s1663_s1 = scalar_lea.hbm %s2072_s11, 128 }
  0x77   : > { %p1664_p3 = scmp.ne.s32.totalorder %s2072_s11, %s1663_s1  ;;  %s1668_s20 = scalar_lea.hbm %s2297_s3, 256 }
  0x78   : > { %p1669_p9 = scmp.lt.u32.totalorder %s2072_s11, %s2297_s3  ;;  %p1670_p12 = scmp.lt.u32.totalorder %s1668_s20, %s1663_s1 }
  0x79   : > { %p1666_p10 = pnand %p1664_p3, %p1962_p4  ;;  %p1672_p6 = scmp.lt.u32.totalorder %s1663_s1, %s2072_s11 }
  0x7a   : > { %p1671_p1 = por %p1670_p12, %p1669_p9 }
  0x7b   : > { %p1667_p8 = pneg %p1666_p10 }
  0x7c   : > { %p1673_p13 = por %p1672_p6, %p1671_p1 }
  0x7e   : > { %p1674_p11 = pnand %p1673_p13, %p1667_p8 }
  0x80   : > { %1677 = shalt.err (!%p1674_p11)
}
  0x81   : > { %s1678_s13 = scalar_lea.vmem %s2076_s16, 128  ;;  %s1822_s10 = smov [#allocation8]  }
  0x82   : > { %p1679_p2 = scmp.ne.s32.totalorder %s2076_s16, %s1678_s13  ;;  %s1683_s28 = sshll.u32 %s1822_s10, 4  ;;  %s1684_s28 = int_to_ptr.vmem [resolvable:$false] %s1683_s28 }
  0x83   : > { %s1685_s0 = scalar_lea.vmem %s1684_s28, 256  ;;  %p1686_p3 = scmp.lt.s32.totalorder %s2076_s16, %s1684_s28 }
  0x84   : > { %p1681_p5 = pnand %p1679_p2, %p1962_p4  ;;  %p1687_p10 = scmp.lt.s32.totalorder %s1685_s0, %s1678_s13 }
  0x86   : > { %p1682_p7 = pneg %p1681_p5  ;;  %p1688_p9 = por %p1687_p10, %p1686_p3 }
  0x88   : > { %p1689_p12 = pnand %p1688_p9, %p1682_p7 }
  0x8a   : > { %1692 = shalt.err (!%p1689_p12)
}
  0x8b   : > { %s1823_s15 = smov 32   ;;  %s1824_s8 = smov 2  }
  0x8c   : > { %1491 = dma.hbm_to_vmem [thread:$0]  (!%p1940_p0), %s2072_s11, 128, %s2076_s16, %s315_s18, %s1823_s15, %s1823_s15, %s1824_s8  }
  0x8d   : > { %p2333_p4 = scmp.ne.s32.totalorder %s2329_s17, 0 }
  0x8e   : > { %s2105_s29 = sand.u32 (!%p2333_p4), 1, %s1799_s19   ;;  %p2334_p8 = scmp.ne.s32.totalorder (!%p2333_p4), %s2319_s30, 0 }
  0x8f   : > { %340 = sbr.rel (%p2333_p4) target bundleno = 924 (0x39c), region = 36  ;;  %s2108_s14 = sshll.u32 (!%p2333_p4), %s2105_s29, 5 }
  0x90   : > { %s343_s26 = scalar_lea.sflag (!%p2333_p4), [#allocation3], %s2105_s29  ;;  %s2112_s1 = scalar_lea.vmem (!%p2333_p4), [#allocation2], %s2108_s14 }
  0x96   : > { %1774 = dma.done.wait (%p2334_p8), %s343_s26, 512  }
  0x97   : > { %1776 = vsyncadd (%p2334_p8), %s343_s26, 4294966784  ;;  %s351_s9 = sand.u32 1, %s1892_s24   ;;  %s355_s17 = scalar_lea.vmem [#allocation5], %s2108_s14 }
  0x98   : > { %s352_s12 = scalar_lea.sflag [#allocation6], %s351_s9 }
  0x99   : > { %1778 = dma.done.wait (%p2334_p8), %s352_s12, 1024  }
  0x9a   : > { %1780 = vsyncadd (%p2334_p8), %s352_s12, 4294966272  ;;  %s1373_s11 = sshll.u32 %s2105_s29, 3  ;;  %s2126_s16 = scalar_lea.vmem [#allocation7], %s2108_s14 }
  0x9b   : > { %s370_s18 = scalar_lea.sflag [#allocation9], %s2105_s29  ;;  %s2129_s27 = scalar_lea.vmem [#allocation8], %s1373_s11 }
  0x9c   : > { %1782 = dma.done.wait (%p2334_p8), %s370_s18, 128  }
  0x9d   : > { %1784 = vsyncadd (%p2334_p8), %s370_s18, 4294967168  ;;  %v1825_v0 = vmov 0.0   ;;  %vm1826_vm0 = vmmov 0   ;;  %vm450_vm1 = vcmask 261120   ;;  %v430_v1 = vld [vmem:[%s355_s17] sm:$0xff]  ;;  %v431_v3 = vld [vmem:[%s355_s17 + $0x8] sm:$0xff] }
  0x9e   : > { %1426 = vmatprep.subr.mxu0 %v1825_v0  ;;  %1428 = vmatprep.mubr.msk.f32.mxu0 %vm1826_vm0, %v1825_v0  ;;  %v426_v2 = vld [vmem:[%s2112_s1] sm:$0xff]  ;;  %v427_v5 = vld [vmem:[%s2112_s1 + $0x8] sm:$0xff]  ;;  %v428_v6 = vld [vmem:[%s2112_s1 + $0x10] sm:$0xff]  ;;  %vm763_vm4 = vcmask 64512   ;;  %s419_s24 = scalar_lea.vmem [#allocation11], %s2108_s14  ;;  %s1400_s30 = sshll.u32 %s1807_s21, 9 }
  0x9f   : > { %1431 = vmatprep.subr.mxu1 %v1825_v0  ;;  %1433 = vmatprep.mubr.msk.f32.mxu1 %vm1826_vm0, %v1825_v0  ;;  %v446_v4 = vmul.f32 0.17677669, %v426_v2  ;;  %v432_v7 = vld [vmem:[%s355_s17 + $0x10] sm:$0xff]  ;;  %v447_v8 = vmul.f32 0.17677669, %v427_v5  ;;  %v429_v9 = vld [vmem:[%s2112_s1 + $0x18] sm:$0xff]  ;;  %s2199_s23 = scalar_lea.hbm %s2299_s5, %s1400_s30 }
  0xa0   : > { %1427 = vmatpush3.xpose.msk.msra.mxu0 %vm450_vm1, %v430_v1  ;;  %1432 = vmatpush3.xpose.msk.msra.mxu1 %vm450_vm1, %v431_v3  ;;  %v433_v10 = vld [vmem:[%s355_s17 + $0x18] sm:$0xff]  ;;  %v448_v11 = vmul.f32 0.17677669, %v428_v6  ;;  %v449_v12 = vmul.f32 0.17677669, %v429_v9  ;;  %v1403_v13 = vld [vmem:[%s2129_s27] sm:$0xff]  }
  0xa1   : > { %1436 = vmatprep.subr.mxu0 %v1825_v0  ;;  %1441 = vmatprep.subr.mxu1 %v1825_v0  ;;  %v1404_v14 = vunpack.c.0.s8 %v1403_v13  ;;  %v1405_v15 = vunpack.c.1.s8 %v1403_v13  ;;  %v1408_v16 = vunpack.c.2.s8 %v1403_v13  ;;  %v1409_v17 = vunpack.c.3.s8 %v1403_v13  ;;  %v434_v54 = vld [vmem:[%s2126_s16] sm:$0xff]  ;;  %v435_v55 = vld [vmem:[%s2126_s16 + $0x8] sm:$0xff]  ;;  %v436_v62 = vld [vmem:[%s2126_s16 + $0x10] sm:$0xff]  ;;  %s1149_s25 = sshll.u32 %s419_s24, 4  ;;  %s1114_s13 = scalar_lea.sflag [#allocation12], %s2105_s29  ;;  %s2201_s25 = int_to_ptr.vmem [resolvable:$true] %s1149_s25 }
  0xa2   : > { %v437_v3 = vld [vmem:[%s2126_s16 + $0x18] sm:$0xff]  ;;  %s1693_s10 = scalar_lea.vmem %s2201_s25, 512  ;;  %p2335_p1 = scmp.ne.s32.totalorder %s2320_s6, 0 }
  0xa3   : > { %1429 = vmatmul.mubr.msk.f32.vlgmr.msra.gmra.mrb[0].mxu0 %vm450_vm1, %v446_v4  ;;  %1434 = vmatmul.mubr.msk.f32.vlgmr.msra.gmra.mrb[0].mxu1 %vm450_vm1, %v447_v8  ;;  %vm755_vm2 = vcmp.ne.s32.totalorder %v1404_v14, 0  ;;  %vm756_vm3 = vcmp.ne.s32.totalorder %v1405_v15, 0  ;;  %vm757_vm5 = vcmp.ne.s32.totalorder %v1408_v16, 0  ;;  %vm758_vm6 = vcmp.ne.s32.totalorder %v1409_v17, 0  ;;  %p1694_p0 = scmp.ne.s32.totalorder %s2201_s25, %s1693_s10  ;;  %s1827_s28 = smov [#allocation11]  }
  0xa4   : > { %1437 = vmatpush3.xpose.msk.msra.mxu0 %vm450_vm1, %v432_v7  ;;  %1438 = vmatprep.mubr.msk.f32.mxu0 %vm1826_vm0, %v1825_v0  ;;  %s1697_s0 = sshll.u32 %s1827_s28, 4  ;;  %s1698_s0 = int_to_ptr.vmem [resolvable:$false] %s1697_s0 }
  0xa5   : > { %1442 = vmatpush3.xpose.msk.msra.mxu1 %vm450_vm1, %v433_v10  ;;  %1443 = vmatprep.mubr.msk.f32.mxu1 %vm1826_vm0, %v1825_v0  ;;  %p1695_p6 = pnand %p1694_p0, %p2335_p1  ;;  %s1699_s15 = scalar_lea.vmem %s1698_s0, 1024 }
  0xa6   : > { %1446 = vmatprep.subr.mxu0 %v1825_v0  ;;  %1451 = vmatprep.subr.mxu1 %v1825_v0  ;;  %p1700_p11 = scmp.lt.s32.totalorder %s2201_s25, %s1698_s0  ;;  %p1701_p2 = scmp.lt.s32.totalorder %s1699_s15, %s1693_s10 }
  0xa7   : > { %1439 = vmatmul.mubr.msk.f32.vlgmr.msra.gmra.mrb[2].mxu0 %vm450_vm1, %v448_v11  ;;  %p1696_p13 = pneg %p1695_p6 }
  0xa8   : > { %1444 = vmatmul.mubr.msk.f32.vlgmr.msra.gmra.mrb[2].mxu1 %vm450_vm1, %v449_v12  ;;  %1448 = vmatprep.mubr.msk.f32.mxu0 %vm1826_vm0, %v1825_v0  ;;  %p1702_p5 = por %p1701_p2, %p1700_p11 }
  0xa9   : > { %1453 = vmatprep.mubr.msk.f32.mxu1 %vm1826_vm0, %v1825_v0  ;;  %1447 = vmatpush3.msra.mxu0 %v434_v54 }
  0xaa   : > { %1456 = vmatprep.subr.mxu0 %v1825_v0  ;;  %1452 = vmatpush3.msra.mxu1 %v435_v55  ;;  %p1703_p7 = pnand %p1702_p5, %p1696_p13 }
  0xab   : > { %1461 = vmatprep.subr.mxu1 %v1825_v0 }
 0x176   : > { %v523_v18 = vpop.f32.mrb[0].mxu0  ;;  %v599_v19 = vpop.f32.mrb[0].mxu1 }
 0x177   : > { %v759_v20 = vsel %vm755_vm2, -1e+09, %v523_v18  ;;  %v1430_v21 = vpop.f32.mrb[1].mxu0  ;;  %v760_v22 = vsel %vm756_vm3, -1e+09, %v599_v19  ;;  %v1435_v23 = vpop.f32.mrb[1].mxu1 }
 0x178   : > { %v764_v24 = vsel %vm763_vm4, %v759_v20, -inf  ;;  %v767_v26 = vsel %vm763_vm4, %v760_v22, -inf }
 0x179   : > { %765 = vmax.xlane.f32.xlu0 %v764_v24 }
 0x17a   : > { %v675_v25 = vpop.f32.mrb[2].mxu0 }
 0x17b   : > { %v761_v27 = vsel %vm757_vm5, -1e+09, %v675_v25  ;;  %v1440_v28 = vpop.f32.mrb[3].mxu0  ;;  %v751_v29 = vpop.f32.mrb[2].mxu1 }
 0x17c   : > { %v770_v30 = vsel %vm763_vm4, %v761_v27, -inf  ;;  %v762_v31 = vsel %vm758_vm6, -1e+09, %v751_v29  ;;  %v1445_v32 = vpop.f32.mrb[3].mxu1 }
 0x17d   : > { %768 = vmax.xlane.f32.xlu0 %v767_v26  ;;  %771 = vmax.xlane.f32.xlu1 %v770_v30  ;;  %v773_v33 = vsel %vm763_vm4, %v762_v31, -inf }
 0x181   : > { %774 = vmax.xlane.f32.xlu1 %v773_v33 }
 0x206   : > { %v766_v34 = vpop.xlane.xlu0 %765 }
 0x207   : > { %v776_v35 = vsub.f32 %v759_v20, %v766_v34 }
 0x209   : > { %v780_v36 = vmul.f32 1.442695, %v776_v35 }
 0x20a   : > { %v769_v37 = vpop.xlane.xlu0 %768  ;;  %v772_v38 = vpop.xlane.xlu1 %771 }
 0x20b   : > { %1557 = vpow2.f32 %v780_v36  ;;  %v777_v39 = vsub.f32 %v760_v22, %v769_v37  ;;  %v778_v40 = vsub.f32 %v761_v27, %v772_v38 }
 0x20d   : > { %v782_v41 = vmul.f32 1.442695, %v777_v39  ;;  %v784_v42 = vmul.f32 1.442695, %v778_v40 }
 0x20e   : > { %v775_v43 = vpop.xlane.xlu1 %774 }
 0x20f   : > { %1559 = vpow2.f32 %v782_v41  ;;  %v779_v44 = vsub.f32 %v762_v31, %v775_v43 }
 0x210   : > { %1561 = vpow2.f32 %v784_v42 }
 0x211   : > { %v786_v45 = vmul.f32 1.442695, %v779_v44 }
 0x213   : > { %1563 = vpow2.f32 %v786_v45 }
 0x215   : > { %v1558_v46 = vpop.eup %1557 }
 0x216   : > { %v788_v47 = vsel %vm763_vm4, %v1558_v46, 0.0 }
 0x217   : > { %789 = vadd.xlane.f32.xlu0 %v788_v47 }
 0x219   : > { %v1560_v48 = vpop.eup %1559 }
 0x21a   : > { %v1562_v49 = vpop.eup %1561  ;;  %v791_v50 = vsel %vm763_vm4, %v1560_v48, 0.0 }
 0x21b   : > { %792 = vadd.xlane.f32.xlu1 %v791_v50  ;;  %v794_v51 = vsel %vm763_vm4, %v1562_v49, 0.0 }
 0x21c   : > { %795 = vadd.xlane.f32.xlu0 %v794_v51 }
 0x21d   : > { %v1564_v52 = vpop.eup %1563 }
 0x21e   : > { %v797_v53 = vsel %vm763_vm4, %v1564_v52, 0.0 }
 0x21f   : > { %798 = vadd.xlane.f32.xlu1 %v797_v53 }
 0x2a4   : > { %v790_v56 = vpop.xlane.xlu0 %789 }
 0x2a5   : > { %1565 = vrcp.f32 %v790_v56 }
 0x2a8   : > { %v793_v57 = vpop.xlane.xlu1 %792 }
 0x2a9   : > { %v796_v58 = vpop.xlane.xlu0 %795  ;;  %1567 = vrcp.f32 %v793_v57 }
 0x2aa   : > { %1569 = vrcp.f32 %v796_v58 }
 0x2ac   : > { %v799_v59 = vpop.xlane.xlu1 %798 }
 0x2ad   : > { %1571 = vrcp.f32 %v799_v59 }
 0x2af   : > { %v1566_v60 = vpop.eup %1565 }
 0x2b0   : > { %v804_v61 = vmul.f32 %v1566_v60, %v1558_v46 }
 0x2b2   : > { %1100 = vst.msk [vmem:[%s419_s24] sm:$0xff] %vm763_vm4, %v804_v61  ;;  %1449 = vmatmul.mubr.msk.f32.vlgmr.msra.gmra.mrb[4].mxu0 %vm763_vm4, %v804_v61 }
 0x2b3   : > { %v1568_v63 = vpop.eup %1567  ;;  %1457 = vmatpush3.msra.mxu0 %v436_v62  ;;  %1458 = vmatprep.mubr.msk.f32.mxu0 %vm1826_vm0, %v1825_v0 }
 0x2b4   : > { %v1570_v1 = vpop.eup %1569  ;;  %v805_v2 = vmul.f32 %v1568_v63, %v1560_v48 }
 0x2b5   : > { %v806_v4 = vmul.f32 %v1570_v1, %v1562_v49 }
 0x2b6   : > { %1101 = vst.msk [vmem:[%s419_s24 + $0x8] sm:$0xff] %vm763_vm4, %v805_v2  ;;  %1454 = vmatmul.mubr.msk.f32.vlgmr.msra.gmra.mrb[4].mxu1 %vm763_vm4, %v805_v2 }
 0x2b7   : > { %v1572_v5 = vpop.eup %1571  ;;  %1102 = vst.msk [vmem:[%s419_s24 + $0x10] sm:$0xff] %vm763_vm4, %v806_v4  ;;  %1459 = vmatmul.mubr.msk.f32.vlgmr.msra.gmra.mrb[6].mxu0 %vm763_vm4, %v806_v4  ;;  %1462 = vmatpush3.msra.mxu1 %v437_v3 }
 0x2b8   : > { %v807_v6 = vmul.f32 %v1572_v5, %v1564_v52  ;;  %1463 = vmatprep.mubr.msk.f32.mxu1 %vm1826_vm0, %v1825_v0 }
 0x2ba   : > { %1103 = vst.msk [vmem:[%s419_s24 + $0x18] sm:$0xff] %vm763_vm4, %v807_v6  ;;  %1464 = vmatmul.mubr.msk.f32.vlgmr.msra.gmra.mrb[6].mxu1 %vm763_vm4, %v807_v6 }
 0x2bb   : > { %1706 = shalt.err (!%p1703_p7)
}
 0x2bc   : > { %s1707_s8 = scalar_lea.hbm %s2199_s23, 512  ;;  %s1711_s9 = scalar_lea.hbm %s2299_s5, 1024 }
 0x2bd   : > { %p1708_p3 = scmp.ne.s32.totalorder %s2199_s23, %s1707_s8  ;;  %p1712_p12 = scmp.lt.u32.totalorder %s2199_s23, %s2299_s5 }
 0x2be   : > { %p1713_p4 = scmp.lt.u32.totalorder %s1711_s9, %s1707_s8  ;;  %p1715_p0 = scmp.lt.u32.totalorder %s1707_s8, %s2199_s23 }
 0x2bf   : > { %p1709_p10 = pnand %p1708_p3, %p2335_p1 }
 0x2c0   : > { %p1714_p8 = por %p1713_p4, %p1712_p12 }
 0x2c1   : > { %p1710_p9 = pneg %p1709_p10 }
 0x2c2   : > { %p1716_p6 = por %p1715_p0, %p1714_p8 }
 0x2c4   : > { %p1717_p13 = pnand %p1716_p6, %p1710_p9 }
 0x2c6   : > { %1720 = shalt.err (!%p1717_p13)
}
 0x2c7   : > { %s1828_s11 = smov 128   ;;  %s1829_s16 = smov 8  }
 0x2c8   : > { %1476 = dma.vmem_to_hbm [thread:$0]  (%p2335_p1), %s2201_s25, 512, %s2199_s23, %s1114_s13, %s1828_s11, %s1828_s11, %s1829_s16  }
 0x2c9   : > { %s412_s18 = scalar_lea.vmem [#allocation10], %s2108_s14  ;;  %s2241_s7 = scalar_lea.hbm %s2298_s4, %s1400_s30 }
 0x2ca   : > { %s1130_s27 = sshll.u32 %s412_s18, 4  ;;  %s1109_s20 = scalar_lea.sflag [#allocation4], %s2105_s29  ;;  %s2233_s27 = int_to_ptr.vmem [resolvable:$true] %s1130_s27 }
 0x2cb   : > { %s1721_s23 = scalar_lea.vmem %s2233_s27, 512  ;;  %s1830_s25 = smov [#allocation10]  }
 0x2cc   : > { %p1722_p11 = scmp.ne.s32.totalorder %s2233_s27, %s1721_s23  ;;  %s1725_s13 = sshll.u32 %s1830_s25, 4  ;;  %s1726_s13 = int_to_ptr.vmem [resolvable:$false] %s1725_s13 }
 0x2cd   : > { %s1727_s10 = scalar_lea.vmem %s1726_s13, 1024  ;;  %p1728_p7 = scmp.lt.s32.totalorder %s2233_s27, %s1726_s13 }
 0x2ce   : > { %p1723_p2 = pnand %p1722_p11, %p2335_p1  ;;  %p1729_p3 = scmp.lt.s32.totalorder %s1727_s10, %s1721_s23 }
 0x2d0   : > { %p1724_p5 = pneg %p1723_p2  ;;  %p1730_p10 = por %p1729_p3, %p1728_p7 }
 0x2d2   : > { %p1731_p9 = pnand %p1730_p10, %p1724_p5 }
 0x385   : > { %v877_v0 = vpop.f32.mrb[4].mxu0 }
 0x386   : > { %1104 = vst.msk [vmem:[%s412_s18] sm:$0xff] %vm450_vm1, %v877_v0  ;;  %v1450_v7 = vpop.f32.mrb[5].mxu0 }
 0x389   : > { %v950_v8 = vpop.f32.mrb[4].mxu1 }
 0x38a   : > { %1105 = vst.msk [vmem:[%s412_s18 + $0x8] sm:$0xff] %vm450_vm1, %v950_v8  ;;  %v1023_v9 = vpop.f32.mrb[6].mxu0  ;;  %v1455_v10 = vpop.f32.mrb[5].mxu1 }
 0x38b   : > { %1106 = vst.msk [vmem:[%s412_s18 + $0x10] sm:$0xff] %vm450_vm1, %v1023_v9  ;;  %v1460_v11 = vpop.f32.mrb[7].mxu0 }
 0x38d   : > { %v1096_v12 = vpop.f32.mrb[6].mxu1 }
 0x38e   : > { %1107 = vst.msk [vmem:[%s412_s18 + $0x18] sm:$0xff] %vm450_vm1, %v1096_v12  ;;  %v1465_v13 = vpop.f32.mrb[7].mxu1 }
 0x38f   : > { %1734 = shalt.err (!%p1731_p9)
}
 0x390   : > { %s1735_s21 = scalar_lea.hbm %s2241_s7, 512  ;;  %s1739_s0 = scalar_lea.hbm %s2298_s4, 1024 }
 0x391   : > { %p1736_p12 = scmp.ne.s32.totalorder %s2241_s7, %s1735_s21  ;;  %p1740_p0 = scmp.lt.u32.totalorder %s2241_s7, %s2298_s4 }
 0x392   : > { %p1741_p6 = scmp.lt.u32.totalorder %s1739_s0, %s1735_s21  ;;  %p1743_p11 = scmp.lt.u32.totalorder %s1735_s21, %s2241_s7 }
 0x393   : > { %p1737_p4 = pnand %p1736_p12, %p2335_p1 }
 0x394   : > { %p1742_p13 = por %p1741_p6, %p1740_p0 }
 0x395   : > { %p1738_p8 = pneg %p1737_p4 }
 0x396   : > { %p1744_p2 = por %p1743_p11, %p1742_p13 }
 0x398   : > { %p1745_p5 = pnand %p1744_p2, %p1738_p8 }
 0x39a   : > { %1748 = shalt.err (!%p1745_p5)
}
 0x39b   : > { %1475 = dma.vmem_to_hbm [thread:$0]  (%p2335_p1), %s2233_s27, 512, %s2241_s7, %s1109_s20, %s1828_s11, %s1828_s11, %s1829_s16  }
 0x39c PF: > { %s2336_s26 = sld [smem:[#allocation18_spill]]  ;;  %s2337_s1 = sld [smem:[#allocation23_spill]] }
 0x39d   : > { %s2338_s9 = sld [smem:[#allocation20_spill]] }
 0x3a2   : > { %s1164_s12 = sand.u32 1, %s2336_s26   ;;  %p2339_p7 = scmp.ne.s32.totalorder %s2337_s1, 0 }
 0x3a3   : > { %p2340_p3 = scmp.ge.s32.totalorder %s2338_s9, 2  ;;  %s1165_s17 = scalar_lea.sflag [#allocation4], %s1164_s12 }
 0x3a5   : > { %p1493_p10 = pnand %p2340_p3, %p2339_p7 }
 0x3a7   : > { %1786 = dma.done.wait (!%p1493_p10), %s1165_s17, 512  }
 0x3a8   : > { %1788 = vsyncadd (!%p1493_p10), %s1165_s17, 4294966784  ;;  %s1174_s6 = scalar_lea.sflag [#allocation12], %s1164_s12 }
 0x3a9   : > { %1790 = dma.done.wait (!%p1493_p10), %s1174_s6, 512  }
 0x3aa   : > { %1792 = vsyncadd (!%p1493_p10), %s1174_s6, 4294966784  ;;  %s31_s23 = sadd.s32 1, %s2338_s9   ;;  %s2341_s29 = sld [smem:[#allocation19_spill]] }
 0x3ab   : > { %p28_p9 = scmp.ge.s32.totalorder %s31_s23, 4   ;;  %s2342_s20 = sld [smem:[#allocation22_spill]] }
 0x3ac   : > { %s2343_s11 = sld [smem:[#allocation21_spill]]  ;;  %s2344_s18 = smov %s1799_s19 }
 0x3ad   : > { %s2346_s21 = smov %s1811_s22  ;;  %30 = sbr.rel (!%p28_p9) target bundleno = 15 (0xf), region = 135 }
 0x3b0   : > { %s2345_s19 = smov %s2341_s29 }
 0x3b2   : > { %s2347_s22 = smov %s2343_s11 }
 0x3b4   :  { %1179 = vsyncpa [#allocation3], 1 }
 0x3b5   :  { %1181 = vsyncpa [#allocation3 + $0x1], 1 }
 0x3b6   :  { %1182 = vsyncpa [#allocation6], 1 }
 0x3b7   :  { %1184 = vsyncpa [#allocation6 + $0x1], 1 }
 0x3b8   :  { %1185 = vsyncpa [#allocation9], 1 }
 0x3b9   :  { %1187 = vsyncpa [#allocation9 + $0x1], 1 }
 0x3ba   :  { %1188 = vsyncpa [#allocation4], 1 }
 0x3bb   :  { %1190 = vsyncpa [#allocation4 + $0x1], 1 }
 0x3bc   :  { %1191 = vsyncpa [#allocation12], 1 }
 0x3bd   :  { %1193 = vsyncpa [#allocation12 + $0x1], 1 }

</bundles_post_ra>
